<compile_context>
chip_gen: v7x
topology: tpu7x:2x2x1
jax: 0.10.0
libtpu: 0.0.40
codegen_flags: <defaults>
</compile_context>

<pallas_src>
import functools

import jax
import jax.numpy as jnp
from jax.experimental import pallas as pl
from jax.experimental.pallas import tpu as pltpu

SMOOTH = 0.001
LANES = 128
SUBLANES = 8
TILE_ELEMS = SUBLANES * LANES          # 1024
CHUNK_ROWS = 512                       # 512*128*4B = 256 KiB f32 temps per chunk
MAX_BLOCK_BYTES = 4 * 1024 * 1024      # per input, per buffer; 2 in x 2 buf = 16 MiB I/O
VMEM_LIMIT_BYTES = 32 * 1024 * 1024    # within physical VMEM on v5e/v6e/v7x


def _num_tensorcores():
    """2 on v7x (2 TensorCores/chip), 1 on v5e/v6e/unknown."""
    try:
        kind = jax.devices()[0].device_kind.lower()
    except Exception:
        return 1
    if "v7" in kind:
        # TODO(synk): verify with xprof that the "parallel" leading grid axis
        # really shards across both v7x TensorCores; if not, switch it to
        # pltpu.CORE_PARALLEL (or pl.core_map over create_tensorcore_mesh).
        return 2
    return 1


def _logdice_kernel(x_ref, y_ref, xy_ref, card_ref, *,
                    num_chunks, chunk_rows, blocks_per_core, num_full_blocks,
                    apply_nonlin, clip, need_gate):
    c = pl.program_id(0)               # TensorCore-split axis ("parallel")
    b = pl.program_id(1)               # reduction axis ("arbitrary")

    @pl.when(b == 0)
    def _():
        xy_ref[...] = jnp.zeros_like(xy_ref)
        card_ref[...] = jnp.zeros_like(card_ref)

    def block_partials():
        def body(i, carry):
            acc_xy, acc_card = carry
            r0 = pl.multiple_of(i * chunk_rows, chunk_rows)
            x = x_ref[pl.ds(r0, chunk_rows), :].astype(jnp.float32)
            y = y_ref[pl.ds(r0, chunk_rows), :].astype(jnp.float32)
            if apply_nonlin:
                # sigmoid(x) = 0.5*tanh(0.5*x)+0.5: one EUP op + 2 VALU ops,
                # cheaper than exp + exact divide.  A subsequent clip would be
                # a mathematical no-op (sigmoid output is already in (0, 1)),
                # matching the reference semantics of clip-after-sigmoid.
                x = 0.5 * jnp.tanh(0.5 * x) + 0.5
            elif clip:
                x = jnp.clip(x, 0.0, 1.0)
            xy = x * y
            card = x + y               # sum(x) + sum(y) == sum(x + y): one accumulator
            acc_xy = acc_xy + jnp.sum(xy.reshape(-1, SUBLANES, LANES), axis=0)
            acc_card = acc_card + jnp.sum(card.reshape(-1, SUBLANES, LANES), axis=0)
            return acc_xy, acc_card

        zero = jnp.zeros((SUBLANES, LANES), jnp.float32)
        if num_chunks == 1:
            return body(0, (zero, zero))
        return jax.lax.fori_loop(0, num_chunks, body, (zero, zero))

    def accumulate():
        axy, acard = block_partials()
        xy_ref[0] += axy
        card_ref[0] += acard

    if need_gate:
        # Over-provisioned (index-clamped) blocks exist only when the block
        # count is not a multiple of the core count; skip them with a scalar
        # predicate instead of per-element masking.
        @pl.when(c * blocks_per_core + b < num_full_blocks)
        def _():
            accumulate()
    else:
        accumulate()


def log_dice(x, y, *, smooth=SMOOTH, apply_nonlin=True, clip=False):
    """Pallas equivalent of LogDice.forward(x, y). Returns a float32 scalar."""
    assert x.shape == y.shape
    n = int(x.size)
    if n == 0:
        raise ValueError("log_dice: empty input")

    # TODO(synk): this flatten (and the (rows, 128) reshape below) can be a
    # tiled-layout HBM copy when the native trailing dim is not a multiple of
    # 128; a variant that grids over the original shape would avoid it.
    x_flat = jnp.reshape(x, (-1,))
    y_flat = jnp.reshape(y, (-1,))

    rows_aligned = (n // TILE_ELEMS) * SUBLANES     # rows of 128, multiple of 8

    sum_xy = jnp.float32(0.0)
    sum_card = jnp.float32(0.0)
    n_kernel = 0

    if rows_aligned > 0:
        itemsize = max(x.dtype.itemsize, y.dtype.itemsize)
        max_block_rows = (MAX_BLOCK_BYTES // (LANES * itemsize)) // CHUNK_ROWS * CHUNK_ROWS
        max_block_rows = max(max_block_rows, CHUNK_ROWS)

        if rows_aligned >= CHUNK_ROWS:
            block_rows = min(max_block_rows, (rows_aligned // CHUNK_ROWS) * CHUNK_ROWS)
            chunk_rows = CHUNK_ROWS
        else:
            block_rows = rows_aligned
            chunk_rows = rows_aligned
        num_chunks = block_rows // chunk_rows
        num_full_blocks = rows_aligned // block_rows
        rows_kernel = num_full_blocks * block_rows
        n_kernel = rows_kernel * LANES

        num_cores = min(_num_tensorcores(), num_full_blocks)
        blocks_per_core = pl.cdiv(num_full_blocks, num_cores)
        need_gate = (num_cores * blocks_per_core) != num_full_blocks

        if need_gate:
            def in_index_map(c, b):
                return (jnp.minimum(c * blocks_per_core + b, num_full_blocks - 1), 0)
        else:
            def in_index_map(c, b):
                return (c * blocks_per_core + b, 0)

        x2 = x_flat[:n_kernel].reshape(rows_kernel, LANES)
        y2 = y_flat[:n_kernel].reshape(rows_kernel, LANES)

        kernel = functools.partial(
            _logdice_kernel,
            num_chunks=num_chunks, chunk_rows=chunk_rows,
            blocks_per_core=blocks_per_core, num_full_blocks=num_full_blocks,
            apply_nonlin=apply_nonlin, clip=clip, need_gate=need_gate,
        )

        out_xy, out_card = pl.pallas_call(
            kernel,
            out_shape=(
                jax.ShapeDtypeStruct((num_cores, SUBLANES, LANES), jnp.float32),
                jax.ShapeDtypeStruct((num_cores, SUBLANES, LANES), jnp.float32),
            ),
            grid_spec=pltpu.PrefetchScalarGridSpec(
                num_scalar_prefetch=0,
                grid=(num_cores, blocks_per_core),
                in_specs=[
                    pl.BlockSpec((block_rows, LANES), in_index_map),
                    pl.BlockSpec((block_rows, LANES), in_index_map),
                ],
                out_specs=[
                    pl.BlockSpec((1, SUBLANES, LANES), lambda c, b: (c, 0, 0)),
                    pl.BlockSpec((1, SUBLANES, LANES), lambda c, b: (c, 0, 0)),
                ],
            ),
            compiler_params=pltpu.CompilerParams(
                dimension_semantics=("parallel", "arbitrary"),
                vmem_limit_bytes=VMEM_LIMIT_BYTES,
            ),
        )(x2, y2)

        sum_xy = sum_xy + jnp.sum(out_xy)
        sum_card = sum_card + jnp.sum(out_card)

    # Tail (< one block + 1023 elements): tiny, summed in plain JAX instead of
    # paying an extra pad HBM pass + per-element masking in the kernel.
    if n_kernel < n:
        xt = x_flat[n_kernel:].astype(jnp.float32)
        yt = y_flat[n_kernel:].astype(jnp.float32)
        if apply_nonlin:
            xt = jax.nn.sigmoid(xt)
        if clip:
            xt = jnp.clip(xt, 0.0, 1.0)
        sum_xy = sum_xy + jnp.sum(xt * yt)
        sum_card = sum_card + jnp.sum(xt) + jnp.sum(yt)

    intersection = 2.0 * sum_xy + smooth
    cardinal = sum_card + smooth
    return -jnp.log(intersection / cardinal)


def _log_dice_ref(x, y, *, smooth=SMOOTH, apply_nonlin=True, clip=False):
    x = x.astype(jnp.float32)
    y = y.astype(jnp.float32)
    if apply_nonlin:
        x = jax.nn.sigmoid(x)
    if clip:
        x = jnp.clip(x, 0.0, 1.0)
    intersection = 2.0 * jnp.sum(x * y) + smooth
    cardinal = jnp.sum(x) + jnp.sum(y) + smooth
    return -jnp.log(intersection / cardinal)


if __name__ == "__main__":
    key = jax.random.PRNGKey(0)
    kx, ky = jax.random.split(key)

    # NCHW logits + binary target, like the PyTorch module's segmentation use.
    x = jax.random.normal(kx, (2, 4, 16, 16), dtype=jnp.float32)
    y = (jax.random.uniform(ky, (2, 4, 16, 16)) > 0.5).astype(jnp.float32)
    d1 = log_dice(x, y)
    jax.block_until_ready(d1)
    r1 = _log_dice_ref(x, y)
    assert jnp.allclose(d1, r1, rtol=1e-5, atol=1e-5), (d1, r1)

    # No-sigmoid + clip path on a lane-unaligned size (exercises the JAX tail).
    x2 = jax.random.uniform(kx, (3, 5, 7, 11), dtype=jnp.float32)
    y2 = (jax.random.uniform(ky, (3, 5, 7, 11)) > 0.5).astype(jnp.float32)
    d2 = log_dice(x2, y2, apply_nonlin=False, clip=True)
    jax.block_until_ready(d2)
    r2 = _log_dice_ref(x2, y2, apply_nonlin=False, clip=True)
    assert jnp.allclose(d2, r2, rtol=1e-5, atol=1e-5), (d2, r2)

    # bf16 logits, large enough to exercise the in-block chunk loop.
    x3 = jax.random.normal(kx, (4, 4, 128, 128), dtype=jnp.bfloat16)
    y3 = (jax.random.uniform(ky, (4, 4, 128, 128)) > 0.5).astype(jnp.bfloat16)
    d3 = log_dice(x3, y3)
    jax.block_until_ready(d3)
    r3 = _log_dice_ref(x3, y3)
    assert jnp.allclose(d3, r3, rtol=1e-4, atol=1e-4), (d3, r3)

    print("KERNEL_OK")
</pallas_src>

<mosaic_0001>
module attributes {stable_mosaic.version = 11 : i64} {
  func.func @_logdice_kernel(%arg0: i32, %arg1: i32, %arg2: memref<16x128xf32, #tpu.memory_space<vmem>>, %arg3: memref<16x128xf32, #tpu.memory_space<vmem>>, %arg4: memref<1x8x128xf32, #tpu.memory_space<vmem>>, %arg5: memref<1x8x128xf32, #tpu.memory_space<vmem>>) attributes {dimension_semantics = [#tpu.dimension_semantics<parallel>, #tpu.dimension_semantics<arbitrary>], iteration_bounds = array<i64: 1, 1>, scalar_prefetch = 0 : i64, scratch_operands = 0 : i64, tpu.core_type = #tpu.core_type<tc>, window_params = [{transform_indices = @transform_0, window_bounds = array<i64: 16, 128>}, {transform_indices = @transform_1, window_bounds = array<i64: 16, 128>}, {transform_indices = @transform_2, window_bounds = array<i64: 1, 8, 128>}, {transform_indices = @transform_3, window_bounds = array<i64: 1, 8, 128>}]} {
    %c0_i32 = arith.constant 0 : i32
    %0 = arith.cmpi eq, %arg1, %c0_i32 : i32
    %1 = arith.extui %0 : i1 to i32
    %c0_i32_0 = arith.constant 0 : i32
    %2 = arith.cmpi ne, %1, %c0_i32_0 : i32
    scf.if %2 {
      %cst_20 = arith.constant 0.000000e+00 : f32
      %36 = vector.broadcast %cst_20 : f32 to vector<1x8x128xf32>
      %c0_21 = arith.constant 0 : index
      %c0_22 = arith.constant 0 : index
      %c0_23 = arith.constant 0 : index
      %37 = vector.load %arg4[%c0_21, %c0_22, %c0_23] : memref<1x8x128xf32, #tpu.memory_space<vmem>>, vector<1x8x128xf32>
      tpu.vector_store %arg4[%c0_21, %c0_22, %c0_23], %36 {strides = array<i32>} : memref<1x8x128xf32, #tpu.memory_space<vmem>>, vector<1x8x128xf32>,
      %cst_24 = arith.constant 0.000000e+00 : f32
      %38 = vector.broadcast %cst_24 : f32 to vector<1x8x128xf32>
      %c0_25 = arith.constant 0 : index
      %c0_26 = arith.constant 0 : index
      %c0_27 = arith.constant 0 : index
      %39 = vector.load %arg5[%c0_25, %c0_26, %c0_27] : memref<1x8x128xf32, #tpu.memory_space<vmem>>, vector<1x8x128xf32>
      tpu.vector_store %arg5[%c0_25, %c0_26, %c0_27], %38 {strides = array<i32>} : memref<1x8x128xf32, #tpu.memory_space<vmem>>, vector<1x8x128xf32>,
    } else {
    }
    %cst = arith.constant 0.000000e+00 : f32
    %3 = vector.broadcast %cst : f32 to vector<8x128xf32>
    %c0_i32_1 = arith.constant 0 : i32
    %4 = tpu.assume_multiple %c0_i32_1, 16 : i32
    %5 = arith.index_cast %4 : i32 to index
    %c0 = arith.constant 0 : index
    %6 = vector.load %arg2[%5, %c0] : memref<16x128xf32, #tpu.memory_space<vmem>>, vector<16x128xf32>
    %7 = arith.index_cast %4 : i32 to index
    %c0_2 = arith.constant 0 : index
    %8 = vector.load %arg3[%7, %c0_2] : memref<16x128xf32, #tpu.memory_space<vmem>>, vector<16x128xf32>
    %cst_3 = arith.constant 5.000000e-01 : f32
    %9 = vector.broadcast %cst_3 : f32 to vector<16x128xf32>
    %10 = arith.mulf %9, %6 : vector<16x128xf32>
    %11 = math.tanh %10 : vector<16x128xf32>
    %cst_4 = arith.constant 5.000000e-01 : f32
    %12 = vector.broadcast %cst_4 : f32 to vector<16x128xf32>
    %13 = arith.mulf %12, %11 : vector<16x128xf32>
    %cst_5 = arith.constant 5.000000e-01 : f32
    %14 = vector.broadcast %cst_5 : f32 to vector<16x128xf32>
    %15 = arith.addf %13, %14 : vector<16x128xf32>
    %16 = arith.mulf %15, %8 : vector<16x128xf32>
    %17 = arith.addf %15, %8 : vector<16x128xf32>
    %18 = vector.shape_cast %16 : vector<16x128xf32> to vector<2x8x128xf32>
    %cst_6 = arith.constant dense<0.000000e+00> : vector<8x128xf32>
    %19 = vector.multi_reduction <add>, %18, %cst_6 [0] : vector<2x8x128xf32> to vector<8x128xf32>
    %20 = arith.addf %3, %19 : vector<8x128xf32>
    %21 = vector.shape_cast %17 : vector<16x128xf32> to vector<2x8x128xf32>
    %cst_7 = arith.constant dense<0.000000e+00> : vector<8x128xf32>
    %22 = vector.multi_reduction <add>, %21, %cst_7 [0] : vector<2x8x128xf32> to vector<8x128xf32>
    %23 = arith.addf %3, %22 : vector<8x128xf32>
    %c0_8 = arith.constant 0 : index
    %c0_9 = arith.constant 0 : index
    %c0_10 = arith.constant 0 : index
    %24 = vector.load %arg4[%c0_8, %c0_9, %c0_10] : memref<1x8x128xf32, #tpu.memory_space<vmem>>, vector<1x8x128xf32>
    %25 = vector.shape_cast %24 : vector<1x8x128xf32> to vector<8x128xf32>
    %26 = arith.addf %25, %20 : vector<8x128xf32>
    %c0_11 = arith.constant 0 : index
    %c0_12 = arith.constant 0 : index
    %c0_13 = arith.constant 0 : index
    %27 = vector.load %arg4[%c0_11, %c0_12, %c0_13] : memref<1x8x128xf32, #tpu.memory_space<vmem>>, vector<1x8x128xf32>
    %28 = vector.shape_cast %27 : vector<1x8x128xf32> to vector<8x128xf32>
    %29 = vector.shape_cast %26 : vector<8x128xf32> to vector<1x8x128xf32>
    tpu.vector_store %arg4[%c0_11, %c0_12, %c0_13], %29 {strides = array<i32>} : memref<1x8x128xf32, #tpu.memory_space<vmem>>, vector<1x8x128xf32>,
    %c0_14 = arith.constant 0 : index
    %c0_15 = arith.constant 0 : index
    %c0_16 = arith.constant 0 : index
    %30 = vector.load %arg5[%c0_14, %c0_15, %c0_16] : memref<1x8x128xf32, #tpu.memory_space<vmem>>, vector<1x8x128xf32>
    %31 = vector.shape_cast %30 : vector<1x8x128xf32> to vector<8x128xf32>
    %32 = arith.addf %31, %23 : vector<8x128xf32>
    %c0_17 = arith.constant 0 : index
    %c0_18 = arith.constant 0 : index
    %c0_19 = arith.constant 0 : index
    %33 = vector.load %arg5[%c0_17, %c0_18, %c0_19] : memref<1x8x128xf32, #tpu.memory_space<vmem>>, vector<1x8x128xf32>
    %34 = vector.shape_cast %33 : vector<1x8x128xf32> to vector<8x128xf32>
    %35 = vector.shape_cast %32 : vector<8x128xf32> to vector<1x8x128xf32>
    tpu.vector_store %arg5[%c0_17, %c0_18, %c0_19], %35 {strides = array<i32>} : memref<1x8x128xf32, #tpu.memory_space<vmem>>, vector<1x8x128xf32>,
    return
  }
  func.func @transform_0(%arg0: i32, %arg1: i32) -> (i32, i32) {
    %c1_i32 = arith.constant 1 : i32
    %0 = arith.muli %arg0, %c1_i32 : i32
    %1 = arith.addi %0, %arg1 : i32
    %c0_i32 = arith.constant 0 : i32
    %c0_i32_0 = arith.constant 0 : i32
    return %1, %c0_i32 : i32, i32
  }
  func.func @transform_1(%arg0: i32, %arg1: i32) -> (i32, i32) {
    %c1_i32 = arith.constant 1 : i32
    %0 = arith.muli %arg0, %c1_i32 : i32
    %1 = arith.addi %0, %arg1 : i32
    %c0_i32 = arith.constant 0 : i32
    %c0_i32_0 = arith.constant 0 : i32
    return %1, %c0_i32 : i32, i32
  }
  func.func @transform_2(%arg0: i32, %arg1: i32) -> (i32, i32, i32) {
    %c0_i32 = arith.constant 0 : i32
    %c0_i32_0 = arith.constant 0 : i32
    %c0_i32_1 = arith.constant 0 : i32
    return %arg0, %c0_i32, %c0_i32_0 : i32, i32, i32
  }
  func.func @transform_3(%arg0: i32, %arg1: i32) -> (i32, i32, i32) {
    %c0_i32 = arith.constant 0 : i32
    %c0_i32_0 = arith.constant 0 : i32
    %c0_i32_1 = arith.constant 0 : i32
    return %arg0, %c0_i32, %c0_i32_0 : i32, i32, i32
  }
}

</mosaic_0001>

<bundles_post_ra>
// kernel: tpu_custom_call.1
= control target key start
LH: loop header
LB: loop body
LE: loop exit
PB: predicated region body
PF: predicated region fallthrough
CT: control target
= control target key end

     0   :  { %9 = vsyncpa [#allocation3], 0  ;;  %s298_s0 = inlined_call_operand.hbm [shape: f32[16,128], index: 0, kind: input, shape index: {}]   ;;  %s299_s1 = inlined_call_operand.hbm [shape: f32[16,128], index: 1, kind: input, shape index: {}]   ;;  %s300_s2 = inlined_call_operand.hbm [shape: f32[1,8,128], index: 2, kind: output, shape index: {0}]   ;;  %s301_s3 = inlined_call_operand.hbm [shape: f32[1,8,128], index: 3, kind: output, shape index: {1}]  }
   0x1   :  { %10 = vsyncpa [#allocation6], 0 }
   0x2   :  { %11 = vsyncpa [#allocation4], 0 }
   0x3   :  { %12 = vsyncpa [#allocation9], 0  ;;  %s224_s12 = smov [#allocation2]   ;;  %s128_s16 = scalar_lea.hbm %s298_s0, 256 }
   0x4   :  { %s22_s13 = sshll.u32 %s224_s12, 4  ;;  %p129_p0 = scmp.ne.s32.totalorder %s298_s0, %s128_s16  ;;  %s23_s13 = int_to_ptr.vmem [resolvable:$true] %s22_s13 }
   0x5   :  { %p132_p1 = scmp.lt.u32.totalorder %s128_s16, %s298_s0 }
   0x7   :  { %p134_p2 = pnand %p132_p1, %p129_p0 }
   0x9   :  { %137 = shalt.err (!%p134_p2)
}
   0xa   :  { %s138_s21 = scalar_lea.vmem %s23_s13, 256  ;;  %p143_p4 = scmp.lt.s32.totalorder %s23_s13, %s23_s13 }
   0xb   :  { %p139_p3 = scmp.ne.s32.totalorder %s23_s13, %s138_s21  ;;  %p144_p5 = scmp.lt.s32.totalorder %s138_s21, %s138_s21 }
   0xd   :  { %p145_p6 = por %p144_p5, %p143_p4 }
   0xf   :  { %p146_p7 = pnand %p145_p6, %p139_p3 }
  0x11   :  { %149 = shalt.err (!%p146_p7)
}
  0x12   :  { %s225_s22 = smov 128   ;;  %s226_s23 = smov 8  }
  0x13   :  { %28 = dma.hbm_to_vmem [thread:$0]  %s298_s0, 256, %s23_s13, [#allocation3], %s225_s22, %s225_s22, %s226_s23  }
  0x14   :  { %s227_s26 = smov [#allocation5]   ;;  %s150_s30 = scalar_lea.hbm %s299_s1, 256 }
  0x15   :  { %s38_s27 = sshll.u32 %s227_s26, 4  ;;  %p151_p8 = scmp.ne.s32.totalorder %s299_s1, %s150_s30  ;;  %s39_s27 = int_to_ptr.vmem [resolvable:$true] %s38_s27 }
  0x16   :  { %p154_p9 = scmp.lt.u32.totalorder %s150_s30, %s299_s1 }
  0x18   :  { %p156_p10 = pnand %p154_p9, %p151_p8 }
  0x1a   :  { %159 = shalt.err (!%p156_p10)
}
  0x1b   :  { %s160_s8 = scalar_lea.vmem %s39_s27, 256  ;;  %p165_p12 = scmp.lt.s32.totalorder %s39_s27, %s39_s27 }
  0x1c   :  { %p161_p11 = scmp.ne.s32.totalorder %s39_s27, %s160_s8  ;;  %p166_p13 = scmp.lt.s32.totalorder %s160_s8, %s160_s8 }
  0x1e   :  { %p167_p0 = por %p166_p13, %p165_p12 }
  0x20   :  { %p168_p1 = pnand %p167_p0, %p161_p11 }
  0x22   :  { %171 = shalt.err (!%p168_p1)
}
  0x23   :  { %44 = dma.hbm_to_vmem [thread:$0]  %s299_s1, 256, %s39_s27, [#allocation6], %s225_s22, %s225_s22, %s226_s23  }
  0x24   :  { %216 = dma.done.wait [#allocation3], 256  }
  0x25   :  { %217 = vsyncadd [#allocation3], 4294967040 }
  0x26   :  { %218 = dma.done.wait [#allocation6], 256  }
  0x27   :  { %219 = vsyncadd [#allocation6], 4294967040  ;;  %v61_v0 = vld [vmem:[#allocation2] sm:$0xff]  ;;  %v62_v1 = vld [vmem:[#allocation2 + $0x8] sm:$0xff]  ;;  %s228_s1 = smov [#allocation7]   ;;  %s229_s11 = smov [#allocation8]  }
  0x28   :  { %v65_v2 = vmul.f32 0.5, %v61_v0  ;;  %v66_v3 = vmul.f32 0.5, %v62_v1  ;;  %v63_v7 = vld [vmem:[#allocation5] sm:$0xff]  ;;  %v64_v9 = vld [vmem:[#allocation5 + $0x8] sm:$0xff]  ;;  %s93_s10 = sshll.u32 %s228_s1, 4  ;;  %s103_s12 = sshll.u32 %s229_s11, 4  ;;  %s94_s10 = int_to_ptr.vmem [resolvable:$true] %s93_s10  ;;  %s104_s12 = int_to_ptr.vmem [resolvable:$true] %s103_s12 }
  0x29   :  { %s172_s13 = scalar_lea.vmem %s94_s10, 128  ;;  %p177_p3 = scmp.lt.s32.totalorder %s94_s10, %s94_s10 }
  0x2a   :  { %124 = vtanh.f32 %v65_v2  ;;  %p173_p2 = scmp.ne.s32.totalorder %s94_s10, %s172_s13  ;;  %p178_p4 = scmp.lt.s32.totalorder %s172_s13, %s172_s13 }
  0x2b   :  { %126 = vtanh.f32 %v66_v3 }
  0x2c   :  { %p179_p5 = por %p178_p4, %p177_p3 }
  0x2e   :  { %p180_p6 = pnand %p179_p5, %p173_p2 }
  0x34   :  { %v125_v4 = vpop.eup %124 }
  0x35   :  { %v127_v5 = vpop.eup %126  ;;  %v69_v6 = vmul.f32 0.5, %v125_v4 }
  0x36   :  { %v70_v8 = vmul.f32 0.5, %v127_v5 }
  0x37   :  { %v71_v10 = vadd.f32 0.5, %v69_v6 }
  0x38   :  { %v72_v11 = vadd.f32 0.5, %v70_v8 }
  0x39   :  { %v73_v12 = vmul.f32 %v71_v10, %v63_v7  ;;  %v75_v13 = vadd.f32 %v71_v10, %v63_v7 }
  0x3a   :  { %v74_v14 = vmul.f32 %v72_v11, %v64_v9  ;;  %v76_v15 = vadd.f32 %v72_v11, %v64_v9 }
  0x3c   :  { %v77_v16 = vadd.f32 %v74_v14, %v73_v12  ;;  %v79_v17 = vadd.f32 %v76_v15, %v75_v13 }
  0x3e   :  { %83 = vst [vmem:[#allocation7] sm:$0xff] %v77_v16  ;;  %86 = vst [vmem:[#allocation8] sm:$0xff] %v79_v17 }
  0x3f   :  { %183 = shalt.err (!%p180_p6)
}
  0x40   :  { %s184_s16 = scalar_lea.hbm %s300_s2, 128 }
  0x41   :  { %p185_p7 = scmp.ne.s32.totalorder %s300_s2, %s184_s16  ;;  %p188_p8 = scmp.lt.u32.totalorder %s184_s16, %s300_s2 }
  0x43   :  { %p190_p9 = pnand %p188_p8, %p185_p7 }
  0x45   :  { %193 = shalt.err (!%p190_p9)
}
  0x46   :  { %96 = dma.vmem_to_hbm [thread:$0]  %s94_s10, 128, %s300_s2, [#allocation4]  }
  0x47   :  { %s194_s23 = scalar_lea.vmem %s104_s12, 128  ;;  %p199_p11 = scmp.lt.s32.totalorder %s104_s12, %s104_s12 }
  0x48   :  { %p195_p10 = scmp.ne.s32.totalorder %s104_s12, %s194_s23  ;;  %p200_p12 = scmp.lt.s32.totalorder %s194_s23, %s194_s23 }
  0x4a   :  { %p201_p13 = por %p200_p12, %p199_p11 }
  0x4c   :  { %p202_p0 = pnand %p201_p13, %p195_p10 }
  0x4e   :  { %205 = shalt.err (!%p202_p0)
}
  0x4f   :  { %s206_s26 = scalar_lea.hbm %s301_s3, 128 }
  0x50   :  { %p207_p1 = scmp.ne.s32.totalorder %s301_s3, %s206_s26  ;;  %p210_p2 = scmp.lt.u32.totalorder %s206_s26, %s301_s3 }
  0x52   :  { %p212_p3 = pnand %p210_p2, %p207_p1 }
  0x54   :  { %215 = shalt.err (!%p212_p3)
}
  0x55   :  { %106 = dma.vmem_to_hbm [thread:$0]  %s104_s12, 128, %s301_s3, [#allocation9]  }
  0x56   :  { %220 = dma.done.wait [#allocation4], 128  }
  0x57   :  { %221 = vsyncadd [#allocation4], 4294967168 }
  0x58   :  { %222 = dma.done.wait [#allocation9], 128  }
  0x59   :  { %223 = vsyncadd [#allocation9], 4294967168 }
  0x5a   :  { %113 = vsyncpa [#allocation3], 1 }
  0x5b   :  { %114 = vsyncpa [#allocation6], 1 }
  0x5c   :  { %115 = vsyncpa [#allocation4], 1 }
  0x5d   :  { %116 = vsyncpa [#allocation9], 1 }

</bundles_post_ra>
